<compile_context>
chip_gen: v6e
topology: v6e:2x2x1
jax: 0.10.0
libtpu: 0.0.40
codegen_flags: <defaults>
</compile_context>

<pallas_src>
import functools

import jax
import jax.numpy as jnp
from jax.experimental import pallas as pl
from jax.experimental.pallas import tpu as pltpu


def _kl_kernel(x0_ref, x1_ref, part_ref, dpart_ref, *,
               num_rows, block_rows, mask_rows):
    i = pl.program_id(0)

    x0 = x0_ref[...].astype(jnp.float32)
    x1 = x1_ref[...].astype(jnp.float32)

    if mask_rows:
        # Tail block: rows >= num_rows hold unspecified padding -> neutralize.
        row_ids = jax.lax.broadcasted_iota(jnp.int32, x0.shape, 0) + i * block_rows
        valid = row_ids < num_rows
        x0 = jnp.where(valid, x0, 0.0)
        x1 = jnp.where(valid, x1, 0.0)
        # With all-zero padded rows: z0 = z1 = 0, s0 = s1 = N, so both the
        # element term and the per-row d term below are exactly 0.

    # Stable softmax pieces (row-wise max/sum over the lane axis).
    z0 = x0 - jnp.max(x0, axis=-1, keepdims=True)
    z1 = x1 - jnp.max(x1, axis=-1, keepdims=True)
    e1 = jnp.exp(z1)
    s0 = jnp.sum(jnp.exp(z0), axis=-1, keepdims=True)
    s1 = jnp.sum(e1, axis=-1, keepdims=True)

    # p1 * (logp1 - logp0) == (e1/s1) * (z1 - z0) + (e1/s1) * d
    # and sum_row(e1/s1) == 1, so the second term contributes exactly d per
    # row -> keep it out of the full-width expression (saves a VPU add/elem).
    inv_s1 = 1.0 / s1                       # one divide per row
    elem = (e1 * inv_s1) * (z1 - z0)        # (block_rows, N)
    d = jnp.log(s0) - jnp.log(s1)           # (block_rows, 1)

    # Fold the block into lane-resident partials: summing over the leading
    # (vreg-index) axis is pure VPU adds, no cross-lane movement.  The single
    # expensive cross-lane reduce happens once, in the JAX wrapper.
    br, n = elem.shape
    part = jnp.sum(elem.reshape(br // 8, 8, n), axis=0)    # (8, N)
    dpart = jnp.sum(d.reshape(br // 8, 8, 1), axis=0)      # (8, 1)
    part_ref[...] = part.reshape(1, 8, n)
    dpart_ref[...] = dpart.reshape(1, 8, 1)


def _vmem_capacity_bytes():
    try:
        info = pltpu.get_tpu_info()
        cap = getattr(info, "vmem_capacity_bytes", None)
        if cap:
            return int(cap)
    except Exception:
        pass
    return 64 * 1024 * 1024  # conservative: v7x physical per-TC VMEM


def _sublane_multiple(dtype):
    # Min second-to-last tile dim: f32 -> 8, bf16 -> 16, int8/fp8 -> 32.
    return max(8, 32 // jnp.dtype(dtype).itemsize)


def _choose_block_rows(M, N, dtype):
    itemsize = jnp.dtype(dtype).itemsize
    sublane = _sublane_multiple(dtype)
    vmem_cap = _vmem_capacity_bytes()
    usable = int(vmem_cap * 0.70)

    # Per row of block: 2 inputs x 2 pipeline buffers at input dtype,
    # plus ~6 block-sized f32 temporaries the body materializes in VMEM.
    per_row = N * (2 * 2 * itemsize + 6 * 4)

    br = usable // max(per_row, 1)
    br = (br // sublane) * sublane
    m_pad = ((M + sublane - 1) // sublane) * sublane
    br = min(br, 8192, m_pad)
    br = max(br, sublane)

    need = per_row * br + 4 * (8 * N + 8) * 4   # + double-buffered tiny outputs
    vmem_limit = int(min(vmem_cap, max(need + need // 4, 32 * 1024 * 1024)))
    return int(br), vmem_limit


def kl_loss(sim_matrix0, sim_matrix1, *, block_rows=None):
    assert sim_matrix0.shape == sim_matrix1.shape
    assert sim_matrix0.dtype == sim_matrix1.dtype
    # Flatten any leading dims: softmax is over the last axis, mean over all.
    N = sim_matrix0.shape[-1]
    x0 = sim_matrix0.reshape(-1, N)
    x1 = sim_matrix1.reshape(-1, N)
    M = x0.shape[0]

    sublane = _sublane_multiple(x0.dtype)
    auto_br, vmem_limit = _choose_block_rows(M, N, x0.dtype)
    if block_rows is None:
        block_rows = auto_br
    block_rows = max(sublane, (int(block_rows) // sublane) * sublane)

    grid = pl.cdiv(M, block_rows)
    mask_rows = (M % block_rows) != 0

    kernel = functools.partial(
        _kl_kernel,
        num_rows=M,
        block_rows=block_rows,
        mask_rows=mask_rows,
    )

    partials, dparts = pl.pallas_call(
        kernel,
        out_shape=(
            jax.ShapeDtypeStruct((grid, 8, N), jnp.float32),
            jax.ShapeDtypeStruct((grid, 8, 1), jnp.float32),
        ),
        grid_spec=pltpu.PrefetchScalarGridSpec(
            num_scalar_prefetch=0,
            grid=(grid,),
            in_specs=[
                pl.BlockSpec((block_rows, N), lambda i: (i, 0)),
                pl.BlockSpec((block_rows, N), lambda i: (i, 0)),
            ],
            out_specs=[
                pl.BlockSpec((1, 8, N), lambda i: (i, 0, 0)),
                pl.BlockSpec((1, 8, 1), lambda i: (i, 0, 0)),
            ],
        ),
        compiler_params=pltpu.CompilerParams(
            # Each grid step writes its own output blocks -> no cross-step
            # dependence -> "parallel" lets v7x shard rows across both TCs.
            dimension_semantics=("parallel",),
            vmem_limit_bytes=vmem_limit,
        ),
    )(x0, x1)

    total = jnp.sum(partials) + jnp.sum(dparts)
    return total / jnp.float32(M * N)


def _kl_reference(sim_matrix0, sim_matrix1):
    logp0 = jax.nn.log_softmax(sim_matrix0, axis=-1)
    p1 = jax.nn.softmax(sim_matrix1, axis=-1)
    elem = p1 * (jnp.log(p1) - logp0)
    return jnp.mean(elem)


if __name__ == "__main__":
    key = jax.random.PRNGKey(0)
    k0, k1, k2, k3 = jax.random.split(key, 4)

    # Small similarity matrices, e.g. 16 rows x 128 classes (single block).
    sim0 = jax.random.normal(k0, (16, 128), dtype=jnp.float32)
    sim1 = jax.random.normal(k1, (16, 128), dtype=jnp.float32)
    kl = jax.block_until_ready(kl_loss(sim0, sim1))
    ref = _kl_reference(sim0, sim1)
    assert jnp.allclose(kl, ref, atol=1e-5, rtol=1e-5), (kl, ref)

    # Exercise multi-block grid + masked tail block (M=20, block_rows=8).
    sim0b = jax.random.normal(k2, (20, 128), dtype=jnp.float32)
    sim1b = jax.random.normal(k3, (20, 128), dtype=jnp.float32)
    klb = jax.block_until_ready(kl_loss(sim0b, sim1b, block_rows=8))
    refb = _kl_reference(sim0b, sim1b)
    assert jnp.allclose(klb, refb, atol=1e-5, rtol=1e-5), (klb, refb)

    # bf16 streaming path: inputs stay bf16 through the DMA, compute in f32.
    sim0c = sim0.astype(jnp.bfloat16)
    sim1c = sim1.astype(jnp.bfloat16)
    klc = jax.block_until_ready(kl_loss(sim0c, sim1c))
    refc = _kl_reference(sim0c.astype(jnp.float32), sim1c.astype(jnp.float32))
    assert jnp.allclose(klc, refc, atol=5e-3, rtol=5e-3), (klc, refc)

    print("KERNEL_OK")
</pallas_src>

<mosaic_0001>
module attributes {stable_mosaic.version = 11 : i64} {
  func.func @_kl_kernel(%arg0: i32, %arg1: memref<16x128xf32, #tpu.memory_space<vmem>>, %arg2: memref<16x128xf32, #tpu.memory_space<vmem>>, %arg3: memref<1x8x128xf32, #tpu.memory_space<vmem>>, %arg4: memref<1x8x1xf32, #tpu.memory_space<vmem>>) attributes {dimension_semantics = [#tpu.dimension_semantics<parallel>], iteration_bounds = array<i64: 1>, scalar_prefetch = 0 : i64, scratch_operands = 0 : i64, tpu.core_type = #tpu.core_type<tc>, window_params = [{transform_indices = @transform_0, window_bounds = array<i64: 16, 128>}, {transform_indices = @transform_1, window_bounds = array<i64: 16, 128>}, {transform_indices = @transform_2, window_bounds = array<i64: 1, 8, 128>}, {transform_indices = @transform_3, window_bounds = array<i64: 1, 8, 1>}]} {
    %c0 = arith.constant 0 : index
    %c0_0 = arith.constant 0 : index
    %0 = vector.load %arg1[%c0, %c0_0] : memref<16x128xf32, #tpu.memory_space<vmem>>, vector<16x128xf32>
    %c0_1 = arith.constant 0 : index
    %c0_2 = arith.constant 0 : index
    %1 = vector.load %arg2[%c0_1, %c0_2] : memref<16x128xf32, #tpu.memory_space<vmem>>, vector<16x128xf32>
    %cst = arith.constant dense<0xFF800000> : vector<16xf32>
    %2 = vector.multi_reduction <maximumf>, %0, %cst [1] : vector<16x128xf32> to vector<16xf32>
    %3 = vector.shape_cast %2 : vector<16xf32> to vector<16x1xf32>
    %4 = vector.broadcast %3 : vector<16x1xf32> to vector<16x128xf32>
    %5 = arith.subf %0, %4 : vector<16x128xf32>
    %cst_3 = arith.constant dense<0xFF800000> : vector<16xf32>
    %6 = vector.multi_reduction <maximumf>, %1, %cst_3 [1] : vector<16x128xf32> to vector<16xf32>
    %7 = vector.shape_cast %6 : vector<16xf32> to vector<16x1xf32>
    %8 = vector.broadcast %7 : vector<16x1xf32> to vector<16x128xf32>
    %9 = arith.subf %1, %8 : vector<16x128xf32>
    %10 = math.exp %9 : vector<16x128xf32>
    %11 = math.exp %5 : vector<16x128xf32>
    %cst_4 = arith.constant dense<0.000000e+00> : vector<16xf32>
    %12 = vector.multi_reduction <add>, %11, %cst_4 [1] : vector<16x128xf32> to vector<16xf32>
    %13 = vector.shape_cast %12 : vector<16xf32> to vector<16x1xf32>
    %cst_5 = arith.constant dense<0.000000e+00> : vector<16xf32>
    %14 = vector.multi_reduction <add>, %10, %cst_5 [1] : vector<16x128xf32> to vector<16xf32>
    %15 = vector.shape_cast %14 : vector<16xf32> to vector<16x1xf32>
    %cst_6 = arith.constant 1.000000e+00 : f32
    %16 = vector.broadcast %cst_6 : f32 to vector<16x1xf32>
    %17 = arith.divf %16, %15 : vector<16x1xf32>
    %18 = vector.broadcast %17 : vector<16x1xf32> to vector<16x128xf32>
    %19 = arith.mulf %10, %18 : vector<16x128xf32>
    %20 = arith.subf %9, %5 : vector<16x128xf32>
    %21 = arith.mulf %19, %20 : vector<16x128xf32>
    %22 = math.log %13 : vector<16x1xf32>
    %23 = math.log %15 : vector<16x1xf32>
    %24 = arith.subf %22, %23 : vector<16x1xf32>
    %25 = vector.shape_cast %21 : vector<16x128xf32> to vector<2x8x128xf32>
    %cst_7 = arith.constant dense<0.000000e+00> : vector<8x128xf32>
    %26 = vector.multi_reduction <add>, %25, %cst_7 [0] : vector<2x8x128xf32> to vector<8x128xf32>
    %27 = vector.shape_cast %24 : vector<16x1xf32> to vector<2x8x1xf32>
    %cst_8 = arith.constant dense<0.000000e+00> : vector<8x1xf32>
    %28 = vector.multi_reduction <add>, %27, %cst_8 [0] : vector<2x8x1xf32> to vector<8x1xf32>
    %29 = vector.shape_cast %26 : vector<8x128xf32> to vector<1x8x128xf32>
    %c0_9 = arith.constant 0 : index
    %c0_10 = arith.constant 0 : index
    %c0_11 = arith.constant 0 : index
    %30 = vector.load %arg3[%c0_9, %c0_10, %c0_11] : memref<1x8x128xf32, #tpu.memory_space<vmem>>, vector<1x8x128xf32>
    tpu.vector_store %arg3[%c0_9, %c0_10, %c0_11], %29 {strides = array<i32>} : memref<1x8x128xf32, #tpu.memory_space<vmem>>, vector<1x8x128xf32>,
    %31 = vector.shape_cast %28 : vector<8x1xf32> to vector<1x8x1xf32>
    %c0_12 = arith.constant 0 : index
    %c0_13 = arith.constant 0 : index
    %c0_14 = arith.constant 0 : index
    %32 = vector.load %arg4[%c0_12, %c0_13, %c0_14] : memref<1x8x1xf32, #tpu.memory_space<vmem>>, vector<1x8x1xf32>
    tpu.vector_store %arg4[%c0_12, %c0_13, %c0_14], %31 {strides = array<i32>} : memref<1x8x1xf32, #tpu.memory_space<vmem>>, vector<1x8x1xf32>,
    return
  }
  func.func @transform_0(%arg0: i32) -> (i32, i32) {
    %c0_i32 = arith.constant 0 : i32
    %c0_i32_0 = arith.constant 0 : i32
    return %arg0, %c0_i32 : i32, i32
  }
  func.func @transform_1(%arg0: i32) -> (i32, i32) {
    %c0_i32 = arith.constant 0 : i32
    %c0_i32_0 = arith.constant 0 : i32
    return %arg0, %c0_i32 : i32, i32
  }
  func.func @transform_2(%arg0: i32) -> (i32, i32, i32) {
    %c0_i32 = arith.constant 0 : i32
    %c0_i32_0 = arith.constant 0 : i32
    %c0_i32_1 = arith.constant 0 : i32
    return %arg0, %c0_i32, %c0_i32_0 : i32, i32, i32
  }
  func.func @transform_3(%arg0: i32) -> (i32, i32, i32) {
    %c0_i32 = arith.constant 0 : i32
    %c0_i32_0 = arith.constant 0 : i32
    %c0_i32_1 = arith.constant 0 : i32
    return %arg0, %c0_i32, %c0_i32_0 : i32, i32, i32
  }
}

</mosaic_0001>

<bundles_post_ra>
// kernel: tpu_custom_call.1
= control target key start
LH: loop header
LB: loop body
LE: loop exit
PB: predicated region body
PF: predicated region fallthrough
CT: control target
= control target key end

     0   :  { %9 = vsyncpa [#allocation3], 0  ;;  %s247_s0 = inlined_call_operand.hbm [shape: f32[16,128], index: 0, kind: input, shape index: {}]   ;;  %s248_s1 = inlined_call_operand.hbm [shape: f32[16,128], index: 1, kind: input, shape index: {}]   ;;  %s249_s2 = inlined_call_operand.hbm [shape: f32[1,8,128], index: 2, kind: output, shape index: {0}]   ;;  %s250_s3 = inlined_call_operand.vmem [shape: f32[1,8,1], index: 3, kind: output, shape index: {1}]  }
   0x1   :  { %10 = vsyncpa [#allocation6], 0 }
   0x2   :  { %11 = vsyncpa [#allocation4], 0  ;;  %s210_s12 = smov [#allocation2]  }
   0x3   :  { %s17_s13 = sshll.u32 %s210_s12, 4  ;;  %s18_s13 = int_to_ptr.vmem [resolvable:$true] %s17_s13 }
   0x4   :  { %s152_s14 = scalar_lea.vmem %s18_s13, 256  ;;  %p157_p1 = scmp.lt.s32.totalorder %s18_s13, %s18_s13 }
   0x5   :  { %p153_p0 = scmp.ne.s32.totalorder %s18_s13, %s152_s14  ;;  %p158_p2 = scmp.lt.s32.totalorder %s152_s14, %s152_s14 }
   0x7   :  { %p159_p3 = por %p158_p2, %p157_p1 }
   0x9   :  { %p160_p4 = pnand %p159_p3, %p153_p0 }
   0xb   :  { %163 = shalt.err (!%p160_p4)
}
   0xc   :  { %s211_s15 = smov 128   ;;  %s212_s16 = smov 8  }
   0xd   :  { %23 = dma.hbm_to_vmem [thread:$0]  %s247_s0, 256, %s18_s13, [#allocation3], %s211_s15, %s211_s15, %s212_s16  }
   0xe   :  { %s213_s19 = smov [#allocation5]  }
   0xf   :  { %s29_s20 = sshll.u32 %s213_s19, 4  ;;  %s30_s20 = int_to_ptr.vmem [resolvable:$true] %s29_s20 }
  0x10   :  { %s172_s21 = scalar_lea.vmem %s30_s20, 256  ;;  %p177_p6 = scmp.lt.s32.totalorder %s30_s20, %s30_s20 }
  0x11   :  { %p173_p5 = scmp.ne.s32.totalorder %s30_s20, %s172_s21  ;;  %p178_p7 = scmp.lt.s32.totalorder %s172_s21, %s172_s21 }
  0x13   :  { %p179_p8 = por %p178_p7, %p177_p6 }
  0x15   :  { %p180_p9 = pnand %p179_p8, %p173_p5 }
  0x17   :  { %183 = shalt.err (!%p180_p9)
}
  0x18   :  { %35 = dma.hbm_to_vmem [thread:$0]  %s248_s1, 256, %s30_s20, [#allocation6], %s211_s15, %s211_s15, %s212_s16  }
  0x19   :  { %204 = dma.done.wait [#allocation3], 256  }
  0x1a   :  { %205 = vsyncadd [#allocation3], 4294967040 }
  0x1b   :  { %206 = dma.done.wait [#allocation6], 256  }
  0x1c   :  { %207 = vsyncadd [#allocation6], 4294967040  ;;  %v44_v0 = vld [vmem:[#allocation5] sm:$0xff]  ;;  %v42_v1 = vld [vmem:[#allocation2] sm:$0xff]  ;;  %s214_s0 = smov [#allocation7]   ;;  %vm97_vm0 = vcmask 7168  }
  0x1d   :  { %52 = vmax.xlane.f32.xlu0 %v44_v0  ;;  %46 = vmax.xlane.f32.xlu1 %v42_v1  ;;  %v45_v2 = vld [vmem:[#allocation5 + $0x8] sm:$0xff]  ;;  %v43_v3 = vld [vmem:[#allocation2 + $0x8] sm:$0xff]  ;;  %s105_s1 = sshll.u32 %s214_s0, 4  ;;  %s106_s1 = int_to_ptr.vmem [resolvable:$true] %s105_s1 }
  0x1e   :  { %s184_s24 = scalar_lea.vmem %s106_s1, 128  ;;  %p189_p11 = scmp.lt.s32.totalorder %s106_s1, %s106_s1 }
  0x1f   :  { %p185_p10 = scmp.ne.s32.totalorder %s106_s1, %s184_s24  ;;  %p190_p12 = scmp.lt.s32.totalorder %s184_s24, %s184_s24 }
  0x21   :  { %54 = vmax.xlane.f32.xlu0 %v45_v2  ;;  %48 = vmax.xlane.f32.xlu1 %v43_v3  ;;  %p191_p13 = por %p190_p12, %p189_p11 }
  0x23   :  { %p192_p0 = pnand %p191_p13, %p185_p10 }
  0xa6   :  { %v53_v4 = vpop.xlane.xlu0 %52  ;;  %v47_v5 = vpop.xlane.xlu1 %46 }
  0xa7   :  { %v56_v6 = vsub.f32 %v44_v0, %v53_v4  ;;  %v50_v7 = vsub.f32 %v42_v1, %v47_v5 }
  0xa9   :  { %v58_v8 = vmul.f32 1.442695, %v56_v6  ;;  %v62_v9 = vmul.f32 1.442695, %v50_v7  ;;  %v80_v10 = vsub.f32 %v56_v6, %v50_v7 }
  0xaa   :  { %v55_v11 = vpop.xlane.xlu0 %54  ;;  %v49_v12 = vpop.xlane.xlu1 %48 }
  0xab   :  { %124 = vpow2.f32 %v58_v8  ;;  %v57_v13 = vsub.f32 %v45_v2, %v55_v11  ;;  %v51_v14 = vsub.f32 %v43_v3, %v49_v12 }
  0xac   :  { %126 = vpow2.f32 %v62_v9 }
  0xad   :  { %v60_v15 = vmul.f32 1.442695, %v57_v13  ;;  %v64_v16 = vmul.f32 1.442695, %v51_v14  ;;  %v81_v17 = vsub.f32 %v57_v13, %v51_v14 }
  0xaf   :  { %128 = vpow2.f32 %v60_v15 }
  0xb0   :  { %130 = vpow2.f32 %v64_v16 }
  0xb8   :  { %v125_v18 = vpop.eup %124 }
  0xb9   :  { %70 = vadd.xlane.f32.xlu0 %v125_v18  ;;  %v127_v19 = vpop.eup %126 }
  0xbc   :  { %v129_v20 = vpop.eup %128 }
  0xbd   :  { %72 = vadd.xlane.f32.xlu1 %v129_v20  ;;  %66 = vadd.xlane.f32.xlu0 %v127_v19  ;;  %v131_v21 = vpop.eup %130 }
  0xc1   :  { %68 = vadd.xlane.f32.xlu1 %v131_v21 }
 0x142   :  { %v71_v22 = vpop.xlane.xlu0 %70 }
 0x143   :  { %132 = vrcp.f32 %v71_v22 }
 0x144   :  { %134 = vlog2.f32 %v71_v22 }
 0x146   :  { %v67_v23 = vpop.xlane.xlu0 %66  ;;  %v73_v24 = vpop.xlane.xlu1 %72 }
 0x147   :  { %136 = vlog2.f32 %v67_v23 }
 0x148   :  { %138 = vrcp.f32 %v73_v24 }
 0x149   :  { %140 = vlog2.f32 %v73_v24 }
 0x14a   :  { %v69_v25 = vpop.xlane.xlu1 %68 }
 0x14b   :  { %142 = vlog2.f32 %v69_v25 }
 0x150   :  { %v133_v26 = vpop.eup %132 }
 0x151   :  { %v135_v27 = vpop.eup %134  ;;  %v78_v29 = vmul.f32 %v133_v26, %v125_v18 }
 0x152   :  { %v89_v37 = vmul.f32 0.6931472, %v135_v27 }
 0x153   :  { %v82_v35 = vmul.f32 %v80_v10, %v78_v29 }
 0x154   :  { %v137_v28 = vpop.eup %136 }
 0x155   :  { %v139_v30 = vpop.eup %138  ;;  %v85_v33 = vmul.f32 0.6931472, %v137_v28 }
 0x156   :  { %v141_v31 = vpop.eup %140  ;;  %v79_v32 = vmul.f32 %v139_v30, %v129_v20 }
 0x157   :  { %v91_v38 = vmul.f32 0.6931472, %v141_v31  ;;  %v92_v41 = vsub.f32 %v85_v33, %v89_v37 }
 0x158   :  { %v143_v34 = vpop.eup %142  ;;  %v83_v36 = vmul.f32 %v81_v17, %v79_v32 }
 0x159   :  { %v87_v39 = vmul.f32 0.6931472, %v143_v34 }
 0x15a   :  { %v94_v40 = vadd.f32 %v83_v36, %v82_v35 }
 0x15b   :  { %v93_v42 = vsub.f32 %v87_v39, %v91_v38 }
 0x15c   :  { %96 = vst [vmem:[#allocation7] sm:$0xff] %v94_v40 }
 0x15d   :  { %v95_v43 = vadd.f32 %v93_v42, %v92_v41 }
 0x15e   :  { %195 = shalt.err (!%p192_p0)
}
 0x15f   :  { %108 = dma.vmem_to_hbm [thread:$0]  %s106_s1, 128, %s249_s2, [#allocation4]   ;;  %98 = vst.msk [vmem:[%s250_s3] sm:$0xff] %vm97_vm0, %v95_v43 }
 0x160   :  { %208 = dma.done.wait [#allocation4], 128  }
 0x161   :  { %209 = vsyncadd [#allocation4], 4294967168 }
 0x162   :  { %116 = vsyncpa [#allocation3], 1 }
 0x163   :  { %117 = vsyncpa [#allocation6], 1 }
 0x164   :  { %118 = vsyncpa [#allocation4], 1 }

</bundles_post_ra>
